<compile_context>
chip_gen: v7x
topology: tpu7x:2x2x1
jax: 0.10.0
libtpu: 0.0.40
codegen_flags: <defaults>
</compile_context>

<pallas_src>
import functools

import jax
import jax.numpy as jnp
from jax.experimental import pallas as pl
from jax.experimental.pallas import tpu as pltpu

LANE = 128
SUB = 8


def _round_up(n, m):
    return ((n + m - 1) // m) * m


def _row_tiling(M, max_tile=256):
    """Pick a row tile (multiple of 8) and the padded row count."""
    m8 = _round_up(M, SUB)
    if m8 <= max_tile:
        return m8, m8
    return _round_up(M, max_tile), max_tile


def _pad2(x, rows, cols):
    return jnp.pad(x, ((0, rows - x.shape[0]), (0, cols - x.shape[1])))


# ----------------------------------------------------------------------------
# Pallas kernel 1: merged (img_embed | att_embed) Linear + PReLU, grid=(2,)
#   stacked weights (2, F_pad, D_pad); PReLU alpha read from SMEM.
# ----------------------------------------------------------------------------
def _embed_prelu_kernel(x_ref, w_ref, b_ref, alpha_ref, o_ref):
    y = jnp.dot(x_ref[...], w_ref[...], preferred_element_type=jnp.float32)
    y = y + b_ref[...]
    alpha = alpha_ref[pl.program_id(0)]          # scalar read from SMEM
    o_ref[...] = jnp.where(y > 0, y, alpha * y).astype(o_ref.dtype)


def embed_prelu(x_stack, w_stack, b_stack, alphas, *, use_pallas=True):
    G, R, F = x_stack.shape
    D = w_stack.shape[2]
    if not use_pallas:                            # pure-JAX reference path
        y = jnp.einsum("grf,gfd->grd", x_stack, w_stack) + b_stack
        return jnp.where(y > 0, y, alphas[:, None, None] * y)
    return pl.pallas_call(
        _embed_prelu_kernel,
        out_shape=jax.ShapeDtypeStruct((G, R, D), jnp.float32),
        grid=(G,),
        in_specs=[
            pl.BlockSpec((None, R, F), lambda i: (i, 0, 0)),
            pl.BlockSpec((None, F, D), lambda i: (i, 0, 0)),
            pl.BlockSpec((None, 1, D), lambda i: (i, 0, 0)),
            pl.BlockSpec(memory_space=pltpu.MemorySpace.SMEM),
        ],
        out_specs=pl.BlockSpec((None, R, D), lambda i: (i, 0, 0)),
        compiler_params=pltpu.CompilerParams(
            dimension_semantics=("parallel",),
            vmem_limit_bytes=32 * 1024 * 1024),
    )(x_stack, w_stack, b_stack, alphas)


# ----------------------------------------------------------------------------
# Pallas kernel 2: fused FFN + residual + LayerNorm (per decoder layer)
#   x_out = LN(x + relu(x @ W1 + b1) @ W2 + b2)
#   Padded feature columns of x / weights / gamma / beta are zero, so the
#   LayerNorm statistics use sums over the padded width divided by the logical
#   feature count and remain exact.
# ----------------------------------------------------------------------------
def _ffn_res_ln_kernel(inv_d, x_ref, w1_ref, b1_ref, w2_ref, b2_ref,
                       g_ref, beta_ref, o_ref):
    x = x_ref[...]
    h = jnp.dot(x, w1_ref[...], preferred_element_type=jnp.float32) + b1_ref[...]
    h = jnp.maximum(h, 0.0)
    f = jnp.dot(h, w2_ref[...], preferred_element_type=jnp.float32) + b2_ref[...]
    y = x + f
    mu = jnp.sum(y, axis=-1, keepdims=True) * inv_d
    var = jnp.sum(y * y, axis=-1, keepdims=True) * inv_d - mu * mu
    o_ref[...] = ((y - mu) * jax.lax.rsqrt(var + 1e-6) * g_ref[...]
                  + beta_ref[...]).astype(o_ref.dtype)


def ffn_res_ln(x, w1, b1, w2, b2, gamma, beta, d_logical, *, use_pallas=True):
    M, Dp = x.shape
    I = w1.shape[1]
    if not use_pallas:
        h = jnp.maximum(x @ w1 + b1, 0.0)
        y = x + h @ w2 + b2
        mu = jnp.sum(y, -1, keepdims=True) / d_logical
        var = jnp.sum(y * y, -1, keepdims=True) / d_logical - mu * mu
        return (y - mu) * jax.lax.rsqrt(var + 1e-6) * gamma + beta
    M_pad, tm = _row_tiling(M)
    x_p = jnp.pad(x, ((0, M_pad - M), (0, 0)))
    out = pl.pallas_call(
        functools.partial(_ffn_res_ln_kernel, 1.0 / float(d_logical)),
        out_shape=jax.ShapeDtypeStruct((M_pad, Dp), jnp.float32),
        grid=(M_pad // tm,),
        in_specs=[
            pl.BlockSpec((tm, Dp), lambda i: (i, 0)),
            pl.BlockSpec((Dp, I), lambda i: (0, 0)),
            pl.BlockSpec((1, I), lambda i: (0, 0)),
            pl.BlockSpec((I, Dp), lambda i: (0, 0)),
            pl.BlockSpec((1, Dp), lambda i: (0, 0)),
            pl.BlockSpec((1, Dp), lambda i: (0, 0)),
            pl.BlockSpec((1, Dp), lambda i: (0, 0)),
        ],
        out_specs=pl.BlockSpec((tm, Dp), lambda i: (i, 0)),
        compiler_params=pltpu.CompilerParams(
            dimension_semantics=("parallel",),
            vmem_limit_bytes=32 * 1024 * 1024),
    )(x_p, w1, b1, w2, b2, gamma, beta)
    return out[:M]


# ----------------------------------------------------------------------------
# Pallas kernel 3: fused gate head + projection + log_softmax
#   g      = sigmoid(x . wg + wg_b)                (lane reduce, XLU)
#   logits = (x @ W + b) * g, padded vocab cols -> -1e30
#   out    = log_softmax(logits, -1), gate returned as second output
# ----------------------------------------------------------------------------
def _proj_gate_logsoftmax_kernel(n_valid, x_ref, w_ref, b_ref, wg_w_ref,
                                 wg_b_ref, logs_ref, gate_ref):
    x = x_ref[...]
    glin = jnp.sum(x * wg_w_ref[...], axis=-1, keepdims=True) + wg_b_ref[0]
    g = jax.nn.sigmoid(glin)
    gate_ref[...] = g.astype(gate_ref.dtype)
    logits = jnp.dot(x, w_ref[...], preferred_element_type=jnp.float32)
    logits = (logits + b_ref[...]) * g
    col = jax.lax.broadcasted_iota(jnp.int32, logits.shape, 1)
    logits = jnp.where(col < n_valid, logits, -1e30)   # mask padded vocab cols
    m = jnp.max(logits, axis=-1, keepdims=True)
    z = logits - m
    lse = jnp.log(jnp.sum(jnp.exp(z), axis=-1, keepdims=True))
    logs_ref[...] = (z - lse).astype(logs_ref.dtype)


def proj_gate_logsoftmax(x, w, b, wg_w, wg_b, n_valid, *, use_pallas=True):
    M, Dp = x.shape
    Vp = w.shape[1]
    if not use_pallas:
        g = jax.nn.sigmoid(jnp.sum(x * wg_w, -1, keepdims=True) + wg_b[0])
        logits = (x @ w + b) * g
        logits = jnp.where(jnp.arange(Vp)[None, :] < n_valid, logits, -1e30)
        return jax.nn.log_softmax(logits, axis=-1), g
    M_pad, tm = _row_tiling(M)
    x_p = jnp.pad(x, ((0, M_pad - M), (0, 0)))
    logs, gate = pl.pallas_call(
        functools.partial(_proj_gate_logsoftmax_kernel, n_valid),
        out_shape=(jax.ShapeDtypeStruct((M_pad, Vp), jnp.float32),
                   jax.ShapeDtypeStruct((M_pad, 1), jnp.float32)),
        grid=(M_pad // tm,),
        in_specs=[
            pl.BlockSpec((tm, Dp), lambda i: (i, 0)),
            pl.BlockSpec((Dp, Vp), lambda i: (0, 0)),
            pl.BlockSpec((1, Vp), lambda i: (0, 0)),
            pl.BlockSpec((1, Dp), lambda i: (0, 0)),
            pl.BlockSpec(memory_space=pltpu.MemorySpace.SMEM),
        ],
        out_specs=(pl.BlockSpec((tm, Vp), lambda i: (i, 0)),
                   pl.BlockSpec((tm, 1), lambda i: (i, 0))),
        compiler_params=pltpu.CompilerParams(
            dimension_semantics=("parallel",),
            vmem_limit_bytes=32 * 1024 * 1024),
    )(x_p, w, b, wg_w, wg_b)
    return logs[:M], gate[:M]


# ----------------------------------------------------------------------------
# Simplified transformer decoder (stand-in for transformer_utils decoder).
# Residual stream runs at D_pad = 128 lanes with zero-padded columns.
# ----------------------------------------------------------------------------
def _layer_norm_padded(y, gamma, beta, d_logical, eps=1e-6):
    # y, gamma, beta all zero in the padded feature columns.
    mu = jnp.sum(y, axis=-1, keepdims=True) / d_logical
    var = jnp.sum(y * y, axis=-1, keepdims=True) / d_logical - mu * mu
    return (y - mu) * jax.lax.rsqrt(var + eps) * gamma + beta


def _mha(q_in, kv_in, p, mask):
    B, Lq, _ = q_in.shape
    H, dk, dv = p["H"], p["dk"], p["dv"]
    q = (q_in @ p["wq"]).reshape(B, Lq, H, dk)
    k = (kv_in @ p["wk"]).reshape(B, -1, H, dk)
    v = (kv_in @ p["wv"]).reshape(B, -1, H, dv)
    scores = jnp.einsum("bqhd,bkhd->bhqk", q, k) / jnp.sqrt(jnp.float32(dk))
    scores = jnp.where(mask[:, None, :, :], scores, -1e9)
    attn = jax.nn.softmax(scores, axis=-1)
    out = jnp.einsum("bhqk,bkhd->bqhd", attn, v).reshape(B, Lq, H * dv)
    return out @ p["wo"]


def _sinusoid_table(n_pos, d):
    pos = jnp.arange(n_pos, dtype=jnp.float32)[:, None]
    i = jnp.arange(d, dtype=jnp.float32)[None, :]
    angle = pos / jnp.power(10000.0, (2.0 * jnp.floor(i / 2.0)) / d)
    tab = jnp.where((jnp.arange(d) % 2) == 0, jnp.sin(angle), jnp.cos(angle))
    return tab.at[0].set(0.0)  # index 0 = padding position


def decoder_forward(dp, target_seq, target_pos, fc_emb, att_emb, masks, dims,
                    *, use_pallas=True):
    B, L = target_seq.shape
    D, Dp = dims["D"], dims["D_pad"]
    x = dp["word_emb"][target_seq] + dp["pos_tab"][target_pos]     # (B,L,D_pad)
    # prepend the global fc feature as one extra memory slot for cross-attn
    mem = jnp.concatenate([fc_emb[:, None, :], att_emb], axis=1)   # (B,1+Na,D_pad)
    pad = masks > 0                                                # (B, L)
    causal = jnp.tril(jnp.ones((L, L), dtype=bool))
    self_mask = causal[None, :, :] & pad[:, None, :]
    cross_mask = jnp.ones((B, L, mem.shape[1]), dtype=bool)
    for layer in dp["layers"]:
        a = _mha(x, x, layer["self"], self_mask)
        x = _layer_norm_padded(x + a, layer["ln1_g"], layer["ln1_b"], D)
        c = _mha(x, mem, layer["cross"], cross_mask)
        x = _layer_norm_padded(x + c, layer["ln2_g"], layer["ln2_b"], D)
        x = ffn_res_ln(x.reshape(B * L, Dp),
                       layer["ffn_w1"], layer["ffn_b1"],
                       layer["ffn_w2"], layer["ffn_b2"],
                       layer["ln3_g"], layer["ln3_b"], D,
                       use_pallas=use_pallas).reshape(B, L, Dp)
    x = x * pad[..., None].astype(x.dtype)
    return x


# ----------------------------------------------------------------------------
# Model: parameter init (pre-padded / pre-shaped once) + forward
# ----------------------------------------------------------------------------
class Opt:
    model_size = 32
    vocab_size = 30
    seq_length = 8
    drop_prob_lm = 0.0          # inference: no dropout
    att_feat_size = 24
    head_size = 4
    n_layers = 2
    k_size = 8
    v_size = 8
    inner_layer_size = 64


def init_params(opt, key):
    D, F, V1 = opt.model_size, opt.att_feat_size, opt.vocab_size + 1
    H, dk, dv, inner = opt.head_size, opt.k_size, opt.v_size, opt.inner_layer_size
    Dp, Fp, Vp, Ip = (_round_up(D, LANE), _round_up(F, LANE),
                      _round_up(V1, LANE), _round_up(inner, LANE))
    keys = iter(jax.random.split(key, 256))
    nk = lambda: next(keys)

    def small(shape):
        return 0.02 * jax.random.normal(nk(), shape, dtype=jnp.float32)

    def xavier(shape):
        std = jnp.sqrt(2.0 / (shape[0] + shape[1]))
        return std * jax.random.normal(nk(), shape, dtype=jnp.float32)

    img_w = _pad2(xavier((F, D)), Fp, Dp)
    att_w = _pad2(xavier((F, D)), Fp, Dp)

    params = {
        "dims": {"D": D, "D_pad": Dp, "F": F, "F_pad": Fp,
                 "V1": V1, "V_pad": Vp, "I": inner, "I_pad": Ip},
        # stacked lane-padded embed weights -> one pallas_call for both heads
        "embed_w": jnp.stack([img_w, att_w], axis=0),       # (2, F_pad, D_pad)
        "embed_b": jnp.zeros((2, 1, Dp), jnp.float32),
        "embed_alpha": jnp.full((2,), 0.25, jnp.float32),    # nn.PReLU() default
        # projection head (lane padded; padded vocab cols masked in-kernel)
        "proj_w": _pad2(small((D, V1)), Dp, Vp),
        "proj_b": jnp.zeros((1, Vp), jnp.float32),
        # gate head (folded into projection kernel), stored as (1, D_pad) row
        "wg_w": _pad2(small((1, D)), 1, Dp),
        "wg_b": jnp.zeros((1,), jnp.float32),
    }

    ones_g = jnp.pad(jnp.ones((1, D), jnp.float32), ((0, 0), (0, Dp - D)))
    zeros_b = jnp.zeros((1, Dp), jnp.float32)

    def attn_params():
        return {"H": H, "dk": dk, "dv": dv,
                "wq": _pad2(small((D, H * dk)), Dp, H * dk),
                "wk": _pad2(small((D, H * dk)), Dp, H * dk),
                "wv": _pad2(small((D, H * dv)), Dp, H * dv),
                "wo": _pad2(small((H * dv, D)), H * dv, Dp)}

    layers = []
    for _ in range(opt.n_layers):
        layers.append({
            "self": attn_params(), "cross": attn_params(),
            "ln1_g": ones_g, "ln1_b": zeros_b,
            "ln2_g": ones_g, "ln2_b": zeros_b,
            "ln3_g": ones_g, "ln3_b": zeros_b,
            "ffn_w1": _pad2(small((D, inner)), Dp, Ip),
            "ffn_b1": jnp.zeros((1, Ip), jnp.float32),
            "ffn_w2": _pad2(small((inner, D)), Ip, Dp),
            "ffn_b2": jnp.zeros((1, Dp), jnp.float32),
        })

    pos_tab = _sinusoid_table(opt.seq_length + 2, D)          # frozen pos embed
    params["dec"] = {
        "word_emb": _pad2(small((V1, D)), V1, Dp),
        "pos_tab": _pad2(pos_tab, pos_tab.shape[0], Dp),
        "layers": layers,
    }
    return params


def forward(params, fc_feats, att_feats, target_seq, masks, *, use_pallas=True):
    dims = params["dims"]
    B, L = target_seq.shape
    Na = att_feats.shape[1]
    F, Fp, Dp, V1 = dims["F"], dims["F_pad"], dims["D_pad"], dims["V1"]

    # target_pos = (1..L) * masks  (as in the PyTorch forward)
    target_pos = jnp.arange(1, L + 1, dtype=jnp.int32)[None, :] * masks.astype(jnp.int32)

    # ---- embed_feats: single Pallas call over both heads (grid=(2,)) ----
    att_flat = att_feats.reshape(B * Na, F)
    R = _round_up(max(B, B * Na), SUB)
    fc_p = jnp.pad(fc_feats, ((0, R - B), (0, Fp - F)))
    att_p = jnp.pad(att_flat, ((0, R - B * Na), (0, Fp - F)))
    x_stack = jnp.stack([fc_p, att_p], axis=0)               # (2, R, F_pad)
    emb = embed_prelu(x_stack, params["embed_w"], params["embed_b"],
                      params["embed_alpha"], use_pallas=use_pallas)
    fc_emb = emb[0, :B, :]                                   # (B, D_pad)
    att_emb = emb[1, :B * Na, :].reshape(B, Na, Dp)          # (B, Na, D_pad)

    # ---- decoder (attention in JAX, FFN+LN fused in Pallas) ----
    output_dec = decoder_forward(params["dec"], target_seq, target_pos,
                                 fc_emb, att_emb, masks, dims,
                                 use_pallas=use_pallas)

    # ---- Pallas fused gate + proj + log_softmax ----
    x2 = output_dec.reshape(B * L, Dp)
    logs, gate = proj_gate_logsoftmax(x2, params["proj_w"], params["proj_b"],
                                      params["wg_w"], params["wg_b"], V1,
                                      use_pallas=use_pallas)
    seq_logsofts = logs[:, :V1].reshape(B, L, V1)
    proj_wg = gate.reshape(B, L, 1)
    return seq_logsofts, proj_wg


if __name__ == "__main__":
    opt = Opt()
    key = jax.random.PRNGKey(0)
    k_param, k_fc, k_att, k_seq = jax.random.split(key, 4)

    params = init_params(opt, k_param)

    B, L, Na = 2, opt.seq_length, 16
    fc_feats = jax.random.normal(k_fc, (B, opt.att_feat_size), dtype=jnp.float32)
    att_feats = jax.random.normal(k_att, (B, Na, opt.att_feat_size), dtype=jnp.float32)
    target_seq = jax.random.randint(k_seq, (B, L), 0, opt.vocab_size + 1)
    masks = jnp.ones((B, L), jnp.float32).at[:, -2:].set(0.0)   # pad last 2 steps

    seq_logsofts, proj_wg = forward(params, fc_feats, att_feats, target_seq,
                                    masks, use_pallas=True)
    jax.block_until_ready((seq_logsofts, proj_wg))

    # pure-JAX reference with the exact same (padded) parameters
    ref_logs, ref_wg = forward(params, fc_feats, att_feats, target_seq,
                               masks, use_pallas=False)
    jax.block_until_ready((ref_logs, ref_wg))

    assert seq_logsofts.shape == (B, L, opt.vocab_size + 1)
    assert proj_wg.shape == (B, L, 1)
    # rows of a log_softmax must exp-sum to 1
    assert bool(jnp.allclose(jnp.exp(seq_logsofts).sum(-1), 1.0, atol=1e-4))
    assert bool(jnp.allclose(seq_logsofts, ref_logs, atol=1e-2, rtol=1e-2))
    assert bool(jnp.allclose(proj_wg, ref_wg, atol=1e-2, rtol=1e-2))
    print("KERNEL_OK")
</pallas_src>

<mosaic_0001>
module attributes {stable_mosaic.version = 11 : i64} {
  func.func @_embed_prelu_kernel(%arg0: i32, %arg1: memref<1x32x128xf32, #tpu.memory_space<vmem>>, %arg2: memref<1x128x128xf32, #tpu.memory_space<vmem>>, %arg3: memref<1x1x128xf32, #tpu.memory_space<vmem>>, %arg4: memref<2xf32, #tpu.memory_space<smem>>, %arg5: memref<1x32x128xf32, #tpu.memory_space<vmem>>) attributes {dimension_semantics = [#tpu.dimension_semantics<parallel>], iteration_bounds = array<i64: 2>, scalar_prefetch = 0 : i64, scratch_operands = 0 : i64, tpu.core_type = #tpu.core_type<tc>, window_params = [{transform_indices = @transform_0, window_bounds = array<i64: 1, 32, 128>}, {transform_indices = @transform_1, window_bounds = array<i64: 1, 128, 128>}, {transform_indices = @transform_2, window_bounds = array<i64: 1, 1, 128>}, {transform_indices = @transform_3, window_bounds = array<i64: 2>}, {transform_indices = @transform_4, window_bounds = array<i64: 1, 32, 128>}]} {
    %c0 = arith.constant 0 : index
    %c0_0 = arith.constant 0 : index
    %c0_1 = arith.constant 0 : index
    %0 = vector.load %arg1[%c0, %c0_0, %c0_1] : memref<1x32x128xf32, #tpu.memory_space<vmem>>, vector<1x32x128xf32>
    %1 = vector.shape_cast %0 : vector<1x32x128xf32> to vector<32x128xf32>
    %c0_2 = arith.constant 0 : index
    %c0_3 = arith.constant 0 : index
    %c0_4 = arith.constant 0 : index
    %2 = vector.load %arg2[%c0_2, %c0_3, %c0_4] : memref<1x128x128xf32, #tpu.memory_space<vmem>>, vector<1x128x128xf32>
    %3 = vector.shape_cast %2 : vector<1x128x128xf32> to vector<128x128xf32>
    %cst = arith.constant dense<0.000000e+00> : vector<32x128xf32>
    %4 = tpu.matmul %1, %3, %cst {dimension_numbers = #tpu.dot_dimension_numbers<[1], [0], [0], [1], [0, 0, 1, 1], [], []>} : vector<32x128xf32>, vector<128x128xf32>, vector<32x128xf32> -> vector<32x128xf32>
    %c0_5 = arith.constant 0 : index
    %c0_6 = arith.constant 0 : index
    %c0_7 = arith.constant 0 : index
    %5 = vector.load %arg3[%c0_5, %c0_6, %c0_7] : memref<1x1x128xf32, #tpu.memory_space<vmem>>, vector<1x1x128xf32>
    %6 = vector.shape_cast %5 : vector<1x1x128xf32> to vector<1x128xf32>
    %7 = vector.broadcast %6 : vector<1x128xf32> to vector<32x128xf32>
    %8 = arith.addf %4, %7 : vector<32x128xf32>
    %9 = arith.index_cast %arg0 : i32 to index
    %10 = memref.load %arg4[%9] : memref<2xf32, #tpu.memory_space<smem>>
    %cst_8 = arith.constant 0.000000e+00 : f32
    %11 = vector.broadcast %cst_8 : f32 to vector<32x128xf32>
    %12 = arith.cmpf ogt, %8, %11 : vector<32x128xf32>
    %13 = vector.broadcast %10 : f32 to vector<32x128xf32>
    %14 = arith.mulf %13, %8 : vector<32x128xf32>
    %15 = arith.select %12, %8, %14 : vector<32x128xi1>, vector<32x128xf32>
    %c0_9 = arith.constant 0 : index
    %c0_10 = arith.constant 0 : index
    %c0_11 = arith.constant 0 : index
    %16 = vector.load %arg5[%c0_9, %c0_10, %c0_11] : memref<1x32x128xf32, #tpu.memory_space<vmem>>, vector<1x32x128xf32>
    %17 = vector.shape_cast %16 : vector<1x32x128xf32> to vector<32x128xf32>
    %18 = vector.shape_cast %15 : vector<32x128xf32> to vector<1x32x128xf32>
    tpu.vector_store %arg5[%c0_9, %c0_10, %c0_11], %18 {strides = array<i32>} : memref<1x32x128xf32, #tpu.memory_space<vmem>>, vector<1x32x128xf32>,
    return
  }
  func.func @transform_0(%arg0: i32) -> (i32, i32, i32) {
    %c0_i32 = arith.constant 0 : i32
    %c0_i32_0 = arith.constant 0 : i32
    %c0_i32_1 = arith.constant 0 : i32
    return %arg0, %c0_i32, %c0_i32_0 : i32, i32, i32
  }
  func.func @transform_1(%arg0: i32) -> (i32, i32, i32) {
    %c0_i32 = arith.constant 0 : i32
    %c0_i32_0 = arith.constant 0 : i32
    %c0_i32_1 = arith.constant 0 : i32
    return %arg0, %c0_i32, %c0_i32_0 : i32, i32, i32
  }
  func.func @transform_2(%arg0: i32) -> (i32, i32, i32) {
    %c0_i32 = arith.constant 0 : i32
    %c0_i32_0 = arith.constant 0 : i32
    %c0_i32_1 = arith.constant 0 : i32
    return %arg0, %c0_i32, %c0_i32_0 : i32, i32, i32
  }
  func.func @transform_3(%arg0: i32) -> i32 {
    %c0_i32 = arith.constant 0 : i32
    %c0_i32_0 = arith.constant 0 : i32
    return %c0_i32 : i32
  }
  func.func @transform_4(%arg0: i32) -> (i32, i32, i32) {
    %c0_i32 = arith.constant 0 : i32
    %c0_i32_0 = arith.constant 0 : i32
    %c0_i32_1 = arith.constant 0 : i32
    return %arg0, %c0_i32, %c0_i32_0 : i32, i32, i32
  }
}

</mosaic_0001>

<bundles_post_ra>
// kernel: tpu_custom_call.1
= control target key start
LH: loop header
LB: loop body
LE: loop exit
PB: predicated region body
PF: predicated region fallthrough
CT: control target
= control target key end

     0   :  { %s1198_s0 = inlined_call_operand.hbm [shape: f32[2,32,128], index: 0, kind: input, shape index: {}]   ;;  %s1199_s1 = inlined_call_operand.hbm [shape: f32[2,128,128], index: 1, kind: input, shape index: {}]   ;;  %s1200_s2 = inlined_call_operand.vmem [shape: f32[2,1,128], index: 2, kind: input, shape index: {}]   ;;  %s1201_s3 = inlined_call_operand.vmem [shape: f32[2], index: 3, kind: input, shape index: {}]   ;;  %s1202_s4 = inlined_call_operand.hbm [shape: f32[2,32,128], index: 4, kind: output, shape index: {}]  }
   0x1   :  { %1206 = sst [smem:[#allocation14_spill]] %s1198_s0 }
   0x2   :  { %9 = vsyncpa [#allocation3], 0 }
   0x3   :  { %11 = vsyncpa [#allocation3 + $0x1], 0 }
   0x4   :  { %12 = vsyncpa [#allocation7], 0 }
   0x5   :  { %14 = vsyncpa [#allocation7 + $0x1], 0 }
   0x6   :  { %15 = vsyncpa [#allocation5], 0 }
   0x7   :  { %16 = vsyncpa [#allocation4], 0 }
   0x8   :  { %18 = vsyncpa [#allocation4 + $0x1], 0  ;;  %s925_s15 = smov 0   ;;  %s927_s16 = smov 0  }
   0x9   :  { %s929_s17 = smov 0   ;;  %s931_s18 = smov 0  }
   0xa LB: > { %s946_s19 = sadd.s32 4294967295, %s890_s18   ;;  %s545_s20 = sadd.s32 4294967294, %s890_s18   ;;  %s890_s18 = sphi %s931_s18, %s1224_s18   ;;  %s886_s17 = sphi %s929_s17, %s1223_s17   ;;  %s882_s16 = sphi %s927_s16, %s1222_s16   ;;  %s878_s15 = sphi %s925_s15, %s1221_s15  }
   0xb   : > { %s950_s21 = sadd.s32 1, %s890_s18   ;;  %s31_s22 = sadd.s32 1, %s886_s17 }
   0xc   : > { %s28_s23 = ssub.s32 %s890_s18, %s950_s21  ;;  %p38_p0 = scmp.ne.s32.totalorder %s886_s17, %s882_s16 }
   0xd   : > { %p29_p1 = scmp.eq.s32.totalorder %s28_s23, 0  ;;  %p39_p2 = scmp.eq.s32.totalorder %s890_s18, 0 }
   0xe   : > { %p44_p3 = scmp.ne.s32.totalorder %s882_s16, %s878_s15  ;;  %p1203_p4 = scmp.eq.s32.totalorder %s946_s19, 0 }
   0xf   : > { %s962_s24 = scalar_select %p29_p1, %s886_s17, %s31_s22  }
  0x10   : > { %p964_p5 = por %p39_p2, %p38_p0  ;;  %p970_p6 = por %p1203_p4, %p44_p3 }
  0x11   : > { %p141_p7 = scmp.eq.s32.totalorder %s946_s19, 1  ;;  %p147_p8 = scmp.eq.s32.totalorder %s545_s20, 1 }
  0x12   : > { %s1208_s26 = scalar_select %p970_p6, 1, 0 }
  0x13   : > { %p546_p9 = scmp.ge.s32.totalorder %s890_s18, 1  ;;  %p154_p10 = scmp.lt.s32.totalorder %s890_s18, 3 }
  0x14   : > { %p977_p11 = por %p141_p7, %p38_p0  ;;  %p981_p12 = por %p147_p8, %p44_p3 }
  0x15   : > { %p985_p13 = pnand %p546_p9, %p154_p10  ;;  %s167_s6 = sshll.u32 %s1201_s3, 4  ;;  %s168_s6 = int_to_ptr.vmem [resolvable:$true] %s167_s6 }
  0x16   : > { %s1209_s27 = scalar_select %p977_p11, 1, 0 }
  0x17   : > { %s1210_s28 = scalar_select %p981_p12, 1, 0 }
  0x18   : > { %p685_p1 = pneg %p985_p13  ;;  %p701_p2 = scmp.lt.s32.totalorder %s890_s18, 2 }
  0x19   : > { %s1003_s8 = sand.u32 1, %s886_s17   ;;  %s741_s11 = scalar_lea.vmem %s168_s6, 16 }
  0x1a   : > { %p998_p7 = pnand %p685_p1, %p1203_p4  ;;  %p1007_p3 = pnand %p701_p2, %p964_p5 }
  0x1b   : > { %s549_s10 = sshll.u32 %s1003_s8, 5  ;;  %p742_p8 = scmp.ne.s32.totalorder %s168_s6, %s741_s11 }
  0x1c   : > { %p743_p9 = pneg %p998_p7  ;;  %p749_p1 = scmp.lt.s32.totalorder %s168_s6, %s168_s6 }
  0x1d   : > { %p750_p4 = scmp.lt.s32.totalorder %s741_s11, %s741_s11 }
  0x1e   : > { %p744_p10 = pnand %p743_p9, %p742_p8 }
  0x1f   : > { %p751_p12 = por %p750_p4, %p749_p1 }
  0x20   : > { %p745_p0 = pneg %p744_p10 }
  0x22   : > { %p752_p11 = pnand %p751_p12, %p745_p0 }
  0x24   : > { %755 = shalt.err (!%p752_p11)
}
  0x25   : > { %s892_s12 = smov [#allocation8]   ;;  %s566_s13 = sshll.u32 %s890_s18, 9 }
  0x26   : > { %688 = dma.vmem_to_smem (!%p998_p7), %s168_s6, 16, %s892_s12, [#allocation5]  }
  0x27   : > { %s182_s14 = scalar_lea.vmem [#allocation2], %s549_s10  ;;  %s1214_s0 = sld [smem:[#allocation14_spill]] }
  0x28   : > { %s189_s20 = sshll.u32 %s182_s14, 4  ;;  %s179_s30 = scalar_lea.sflag [#allocation3], %s1003_s8  ;;  %s1022_s20 = int_to_ptr.vmem [resolvable:$true] %s189_s20 }
  0x29   : > { %p758_p5 = pneg %p1007_p3 }
  0x2d   : > { %s1020_s25 = scalar_lea.hbm %s1214_s0, %s566_s13  ;;  %s761_s10 = scalar_lea.hbm %s1214_s0, 1024 }
  0x2e   : > { %s756_s5 = scalar_lea.hbm %s1020_s25, 512  ;;  %p762_p0 = scmp.lt.u32.totalorder %s1020_s25, %s1214_s0 }
  0x2f   : > { %p757_p4 = scmp.ne.s32.totalorder %s1020_s25, %s756_s5  ;;  %p763_p2 = scmp.lt.u32.totalorder %s761_s10, %s756_s5 }
  0x30   : > { %p765_p8 = scmp.lt.u32.totalorder %s756_s5, %s1020_s25 }
  0x31   : > { %p759_p11 = pnand %p758_p5, %p757_p4  ;;  %p764_p7 = por %p763_p2, %p762_p0 }
  0x33   : > { %p760_p12 = pneg %p759_p11  ;;  %p766_p9 = por %p765_p8, %p764_p7 }
  0x35   : > { %p767_p10 = pnand %p766_p9, %p760_p12 }
  0x37   : > { %770 = shalt.err (!%p767_p10)
}
  0x38   : > { %s771_s13 = scalar_lea.vmem %s1022_s20, 512  ;;  %s893_s14 = smov [#allocation2]  }
  0x39   : > { %p772_p1 = scmp.ne.s32.totalorder %s1022_s20, %s771_s13  ;;  %s776_s22 = sshll.u32 %s893_s14, 4  ;;  %s777_s22 = int_to_ptr.vmem [resolvable:$false] %s776_s22 }
  0x3a   : > { %s778_s23 = scalar_lea.vmem %s777_s22, 1024  ;;  %p779_p6 = scmp.lt.s32.totalorder %s1022_s20, %s777_s22 }
  0x3b   : > { %p774_p4 = pnand %p772_p1, %p758_p5  ;;  %p780_p0 = scmp.lt.s32.totalorder %s778_s23, %s771_s13 }
  0x3d   : > { %p775_p11 = pneg %p774_p4  ;;  %p781_p2 = por %p780_p0, %p779_p6 }
  0x3f   : > { %p782_p7 = pnand %p781_p2, %p775_p11 }
  0x41   : > { %785 = shalt.err (!%p782_p7)
}
  0x42   : > { %s894_s5 = smov 128   ;;  %s895_s6 = smov 8  }
  0x43   : > { %692 = dma.hbm_to_vmem [thread:$0]  (!%p1007_p3), %s1020_s25, 512, %s1022_s20, %s179_s30, %s894_s5, %s894_s5, %s895_s6  }
  0x44   : > { %s552_s7 = sshll.u32 %s1003_s8, 7  ;;  %s567_s10 = sshll.u32 %s890_s18, 11 }
  0x45   : > { %s1060_s13 = scalar_lea.hbm %s1199_s1, %s567_s10  ;;  %s203_s14 = scalar_lea.vmem [#allocation6], %s552_s7 }
  0x46   : > { %s210_s22 = sshll.u32 %s203_s14, 4  ;;  %s200_s23 = scalar_lea.sflag [#allocation7], %s1003_s8  ;;  %s1062_s22 = int_to_ptr.vmem [resolvable:$true] %s210_s22 }
  0x47   : > { %s786_s0 = scalar_lea.hbm %s1060_s13, 2048  ;;  %s791_s30 = scalar_lea.hbm %s1199_s1, 4096 }
  0x48   : > { %p787_p6 = scmp.ne.s32.totalorder %s1060_s13, %s786_s0  ;;  %p792_p9 = scmp.lt.u32.totalorder %s1060_s13, %s1199_s1 }
  0x49   : > { %p793_p10 = scmp.lt.u32.totalorder %s791_s30, %s786_s0  ;;  %p795_p4 = scmp.lt.u32.totalorder %s786_s0, %s1060_s13 }
  0x4a   : > { %p789_p12 = pnand %p787_p6, %p758_p5 }
  0x4b   : > { %p794_p1 = por %p793_p10, %p792_p9 }
  0x4c   : > { %p790_p8 = pneg %p789_p12 }
  0x4d   : > { %p796_p11 = por %p795_p4, %p794_p1 }
  0x4f   : > { %p797_p0 = pnand %p796_p11, %p790_p8 }
  0x51   : > { %800 = shalt.err (!%p797_p0)
}
  0x52   : > { %s801_s7 = scalar_lea.vmem %s1062_s22, 2048  ;;  %s896_s12 = smov [#allocation6]  }
  0x53   : > { %p802_p2 = scmp.ne.s32.totalorder %s1062_s22, %s801_s7  ;;  %s806_s14 = sshll.u32 %s896_s12, 4  ;;  %s807_s14 = int_to_ptr.vmem [resolvable:$false] %s806_s14 }
  0x54   : > { %s808_s20 = scalar_lea.vmem %s807_s14, 4096  ;;  %p809_p12 = scmp.lt.s32.totalorder %s1062_s22, %s807_s14 }
  0x55   : > { %p804_p7 = pnand %p802_p2, %p758_p5  ;;  %p810_p9 = scmp.lt.s32.totalorder %s808_s20, %s801_s7 }
  0x57   : > { %p805_p6 = pneg %p804_p7  ;;  %p811_p10 = por %p810_p9, %p809_p12 }
  0x59   : > { %p812_p1 = pnand %p811_p10, %p805_p6 }
  0x5b   : > { %815 = shalt.err (!%p812_p1)
}
  0x5c   : > { %695 = dma.hbm_to_vmem [thread:$0]  (!%p1007_p3), %s1060_s13, 2048, %s1062_s22, %s200_s23, %s894_s5, %s894_s5, %s895_s6  }
  0x5d   : > { %228 = sbr.rel (%p985_p13) target bundleno = 378 (0x17a), region = 36  ;;  %s1096_s0 = sand.u32 (!%p985_p13), 1, %s882_s16  }
  0x5e   : > { %s556_s25 = sshll.u32 (!%p985_p13), %s1096_s0, 5  ;;  %s231_s9 = scalar_lea.sflag (!%p985_p13), [#allocation3], %s1096_s0 }
  0x5f   : > { %s1102_s30 = scalar_lea.vmem (!%p985_p13), [#allocation2], %s556_s25  ;;  %p1215_p5 = scmp.ne.s32.totalorder (!%p985_p13), %s1208_s26, 0 }
  0x64   : > { %861 = dma.done.wait (%p1215_p5), %s231_s9, 512  }
  0x65   : > { %863 = vsyncadd (%p1215_p5), %s231_s9, 4294966784  ;;  %s557_s29 = sshll.u32 %s1096_s0, 7  ;;  %s240_s8 = scalar_lea.sflag [#allocation7], %s1096_s0 }
  0x66   : > { %s1110_s5 = scalar_lea.vmem [#allocation6], %s557_s29 }
  0x67   : > { %865 = dma.done.wait (%p1215_p5), %s240_s8, 2048  }
  0x68   : > { %867 = vsyncadd (%p1215_p5), %s240_s8, 4294965248  ;;  %p1216_p13 = scmp.eq.s32.totalorder %s946_s19, 0 }
  0x6a   : > { %869 = dma.done.wait (%p1216_p13), [#allocation5], 16   ;;  %p1217_p3 = pmov %p1216_p13 }
  0x6c   : > { %871 = vsyncadd (%p1217_p3), [#allocation5], 4294967280 }
  0x6d   : > { %252 = sfence }
  0x6e   : > { %v288_v0 = vld [vmem:[%s1110_s5] sm:$0xff]  ;;  %v289_v1 = vld [vmem:[%s1110_s5 + $0x8] sm:$0xff]  ;;  %v290_v2 = vld [vmem:[%s1110_s5 + $0x10] sm:$0xff]  ;;  %p281_p8 = scmp.lt.s32.totalorder %s946_s19, 1  ;;  %s396_s6 = sld [smem:[#allocation8 + %s946_s19]] }
  0x6f   : > { %v627_v3 = vpack.c.bf16 %v289_v1, %v288_v0  ;;  %v291_v4 = vld [vmem:[%s1110_s5 + $0x18] sm:$0xff]  ;;  %v292_v6 = vld [vmem:[%s1110_s5 + $0x20] sm:$0xff]  ;;  %v293_v7 = vld [vmem:[%s1110_s5 + $0x28] sm:$0xff]  ;;  %s280_s10 = scalar_lea.vmem [#allocation9], %s556_s25  ;;  %s568_s7 = sshll.u32 %s946_s19, 9 }
  0x70   : > { %v631_v5 = vpack.c.bf16 %v291_v4, %v290_v2  ;;  %v635_v8 = vpack.c.bf16 %v293_v7, %v292_v6  ;;  %v284_v9 = vld [vmem:[%s1102_s30] sm:$0xff]  ;;  %v286_v10 = vld [vmem:[%s1102_s30 + $0x10] sm:$0xff]  ;;  %v295_v12 = vld [vmem:[%s1110_s5 + $0x38] sm:$0xff]  ;;  %s282_s26 = scalar_select %p281_p8, %s946_s19, 1 }
  0x71   : > { %628 = vmatprep.subr.bf16.mxu0 %v627_v3  ;;  %659 = vmatprep.subr.bf16.mxu1 %v627_v3  ;;  %v294_v11 = vld [vmem:[%s1110_s5 + $0x30] sm:$0xff]  ;;  %v296_v14 = vld [vmem:[%s1110_s5 + $0x40] sm:$0xff]  ;;  %v297_v15 = vld [vmem:[%s1110_s5 + $0x48] sm:$0xff]  ;;  %s428_s11 = sshll.u32 %s280_s10, 4  ;;  %s1154_s19 = scalar_lea.hbm %s1202_s4, %s568_s7  ;;  %s1149_s11 = int_to_ptr.vmem [resolvable:$true] %s428_s11 }
  0x72   : > { %630 = vmatpush3.bf16.msra.mxu0 %v627_v3  ;;  %667 = vmatpush3.bf16.msra.mxu1 %v627_v3  ;;  %v639_v13 = vpack.c.bf16 %v295_v12, %v294_v11  ;;  %v643_v16 = vpack.c.bf16 %v297_v15, %v296_v14  ;;  %v298_v17 = vld [vmem:[%s1110_s5 + $0x50] sm:$0xff]  ;;  %v299_v18 = vld [vmem:[%s1110_s5 + $0x58] sm:$0xff]  ;;  %v300_v20 = vld [vmem:[%s1110_s5 + $0x60] sm:$0xff]  ;;  %s283_s23 = scalar_lea.vmem %s1200_s2, %s282_s26  ;;  %s415_s20 = scalar_lea.sflag [#allocation4], %s1096_s0 }
  0x73   : > { %632 = vmatprep.subr.bf16.mxu0 %v631_v5  ;;  %660 = vmatprep.subr.bf16.mxu1 %v631_v5  ;;  %v647_v19 = vpack.c.bf16 %v299_v18, %v298_v17  ;;  %v301_v21 = vld [vmem:[%s1110_s5 + $0x68] sm:$0xff]  ;;  %v302_v23 = vld [vmem:[%s1110_s5 + $0x70] sm:$0xff]  ;;  %v303_v24 = vld [vmem:[%s1110_s5 + $0x78] sm:$0xff]  ;;  %s816_s25 = scalar_lea.vmem %s1149_s11, 512  ;;  %p1218_p11 = scmp.ne.s32.totalorder %s1209_s27, 0 }
  0x74   : > { %621 = vmatprep.mubr.f32.mxu0 %v284_v9  ;;  %624 = vmatprep.mubr.f32.mxu1 %v286_v10  ;;  %v651_v22 = vpack.c.bf16 %v301_v21, %v300_v20  ;;  %v655_v25 = vpack.c.bf16 %v303_v24, %v302_v23  ;;  %v285_v26 = vld [vmem:[%s1102_s30 + $0x8] sm:$0xff]  ;;  %v287_v27 = vld [vmem:[%s1102_s30 + $0x18] sm:$0xff]  ;;  %v560_v28 = vld [vmem:[%s283_s23] ss:$0 sm:$0xff]  ;;  %v401_v30 = vstv %s396_s6  ;;  %p817_p4 = scmp.ne.s32.totalorder %s1149_s11, %s816_s25  ;;  %s897_s9 = smov [#allocation9]  }
  0x75   : > { %s820_s30 = sshll.u32 %s897_s9, 4  ;;  %s821_s30 = int_to_ptr.vmem [resolvable:$false] %s820_s30 }
  0x76   : > { %634 = vmatpush3.bf16.msra.mxu0 %v631_v5  ;;  %668 = vmatpush3.bf16.msra.mxu1 %v631_v5  ;;  %p818_p0 = pnand %p817_p4, %p1218_p11  ;;  %s822_s29 = scalar_lea.vmem %s821_s30, 1024 }
  0x77   : > { %636 = vmatprep.subr.bf16.mxu0 %v635_v8  ;;  %661 = vmatprep.subr.bf16.mxu1 %v635_v8  ;;  %p823_p7 = scmp.lt.s32.totalorder %s1149_s11, %s821_s30  ;;  %p824_p6 = scmp.lt.s32.totalorder %s822_s29, %s816_s25 }
  0x78   : > { %p819_p2 = pneg %p818_p0 }
  0x79   : > { %p825_p12 = por %p824_p6, %p823_p7 }
  0x7a   : > { %638 = vmatpush3.bf16.msra.mxu0 %v635_v8  ;;  %669 = vmatpush3.bf16.msra.mxu1 %v635_v8 }
  0x7b   : > { %640 = vmatprep.subr.bf16.mxu0 %v639_v13  ;;  %662 = vmatprep.subr.bf16.mxu1 %v639_v13  ;;  %p826_p9 = pnand %p825_p12, %p819_p2 }
  0x7e   : > { %642 = vmatpush3.bf16.msra.mxu0 %v639_v13  ;;  %670 = vmatpush3.bf16.msra.mxu1 %v639_v13 }
  0x7f   : > { %644 = vmatprep.subr.bf16.mxu0 %v643_v16  ;;  %663 = vmatprep.subr.bf16.mxu1 %v643_v16 }
  0x82   : > { %646 = vmatpush3.bf16.msra.mxu0 %v643_v16  ;;  %671 = vmatpush3.bf16.msra.mxu1 %v643_v16 }
  0x83   : > { %648 = vmatprep.subr.bf16.mxu0 %v647_v19  ;;  %664 = vmatprep.subr.bf16.mxu1 %v647_v19 }
  0x86   : > { %650 = vmatpush3.bf16.msra.mxu0 %v647_v19  ;;  %672 = vmatpush3.bf16.msra.mxu1 %v647_v19 }
  0x87   : > { %652 = vmatprep.subr.bf16.mxu0 %v651_v22  ;;  %665 = vmatprep.subr.bf16.mxu1 %v651_v22 }
  0x8a   : > { %654 = vmatpush3.bf16.msra.mxu0 %v651_v22  ;;  %673 = vmatpush3.bf16.msra.mxu1 %v651_v22 }
  0x8b   : > { %656 = vmatprep.subr.bf16.mxu0 %v655_v25  ;;  %666 = vmatprep.subr.bf16.mxu1 %v655_v25 }
  0x8e   : > { %658 = vmatpush3.bf16.msra.mxu0 %v655_v25  ;;  %674 = vmatpush3.bf16.msra.mxu1 %v655_v25 }
  0x91   : > { %622 = vmatmul.mubr.f32.vlgmr.msra.gmra.mrb[0].mxu0 %v285_v26  ;;  %625 = vmatmul.mubr.f32.vlgmr.msra.gmra.mrb[0].mxu1 %v287_v27 }
 0x164   : > { %v623_v29 = vpop.f32.mrb[0].mxu0  ;;  %v626_v31 = vpop.f32.mrb[0].mxu1 }
 0x165   : > { %v383_v32 = vadd.f32 %v623_v29, %v560_v28  ;;  %v393_v33 = vadd.f32 %v626_v31, %v560_v28  ;;  %v377_v34 = vpop.f32.mrb[1].mxu0  ;;  %v387_v35 = vpop.f32.mrb[1].mxu1 }
 0x166   : > { %v378_v36 = vadd.f32 %v560_v28, %v377_v34  ;;  %v388_v37 = vadd.f32 %v560_v28, %v387_v35 }
 0x167   : > { %vm398_vm0 = vcmp.gt.f32.partialorder %v383_v32, 0.0  ;;  %v403_v38 = vmul.f32 %v401_v30, %v383_v32  ;;  %vm400_vm1 = vcmp.gt.f32.partialorder %v393_v33, 0.0  ;;  %v405_v39 = vmul.f32 %v401_v30, %v393_v33 }
 0x168   : > { %vm397_vm2 = vcmp.gt.f32.partialorder %v378_v36, 0.0  ;;  %v402_v40 = vmul.f32 %v401_v30, %v378_v36  ;;  %vm399_vm3 = vcmp.gt.f32.partialorder %v388_v37, 0.0  ;;  %v404_v41 = vmul.f32 %v401_v30, %v388_v37 }
 0x169   : > { %v407_v42 = vsel %vm398_vm0, %v383_v32, %v403_v38  ;;  %v409_v43 = vsel %vm400_vm1, %v393_v33, %v405_v39 }
 0x16a   : > { %411 = vst [vmem:[%s280_s10 + $0x8] sm:$0xff] %v407_v42  ;;  %413 = vst [vmem:[%s280_s10 + $0x18] sm:$0xff] %v409_v43  ;;  %v406_v44 = vsel %vm397_vm2, %v378_v36, %v402_v40  ;;  %v408_v45 = vsel %vm399_vm3, %v388_v37, %v404_v41 }
 0x16b   : > { %410 = vst [vmem:[%s280_s10] sm:$0xff] %v406_v44  ;;  %412 = vst [vmem:[%s280_s10 + $0x10] sm:$0xff] %v408_v45 }
 0x16c   : > { %829 = shalt.err (!%p826_p9)
}
 0x16d   : > { %s830_s8 = scalar_lea.hbm %s1154_s19, 512  ;;  %s834_s6 = scalar_lea.hbm %s1202_s4, 1024 }
 0x16e   : > { %p831_p10 = scmp.ne.s32.totalorder %s1154_s19, %s830_s8  ;;  %p835_p13 = scmp.lt.u32.totalorder %s1154_s19, %s1202_s4 }
 0x16f   : > { %p836_p3 = scmp.lt.u32.totalorder %s834_s6, %s830_s8  ;;  %p838_p4 = scmp.lt.u32.totalorder %s830_s8, %s1154_s19 }
 0x170   : > { %p832_p1 = pnand %p831_p10, %p1218_p11 }
 0x171   : > { %p837_p8 = por %p836_p3, %p835_p13 }
 0x172   : > { %p833_p5 = pneg %p832_p1 }
 0x173   : > { %p839_p0 = por %p838_p4, %p837_p8 }
 0x175   : > { %p840_p2 = pnand %p839_p0, %p833_p5 }
 0x177   : > { %843 = shalt.err (!%p840_p2)
}
 0x178   : > { %s898_s23 = smov 128   ;;  %s899_s10 = smov 8  }
 0x179   : > { %683 = dma.vmem_to_hbm [thread:$0]  (%p1218_p11), %s1149_s11, 512, %s1154_s19, %s415_s20, %s898_s23, %s898_s23, %s899_s10  }
 0x17a PF: > { %s443_s7 = sand.u32 1, %s878_s15   ;;  %p1219_p7 = scmp.ne.s32.totalorder %s1210_s28, 0 }
 0x17b   : > { %p1220_p6 = scmp.ge.s32.totalorder %s890_s18, 2  ;;  %s444_s12 = scalar_lea.sflag [#allocation4], %s443_s7 }
 0x17d   : > { %p697_p12 = pnand %p1220_p6, %p1219_p7 }
 0x17f   : > { %873 = dma.done.wait (!%p697_p12), %s444_s12, 512  }
 0x180   : > { %875 = vsyncadd (!%p697_p12), %s444_s12, 4294966784  ;;  %p21_p9 = scmp.ge.s32.totalorder %s950_s21, 4   ;;  %s1221_s15 = smov %s882_s16 }
 0x181   : > { %s1222_s16 = smov %s886_s17  ;;  %s1223_s17 = smov %s962_s24 }
 0x182   : > { %s1224_s18 = smov %s950_s21  ;;  %23 = sbr.rel (!%p21_p9) target bundleno = 10 (0xa), region = 102 }
 0x189   :  { %449 = vsyncpa [#allocation3], 1 }
 0x18a   :  { %451 = vsyncpa [#allocation3 + $0x1], 1 }
 0x18b   :  { %452 = vsyncpa [#allocation7], 1 }
 0x18c   :  { %454 = vsyncpa [#allocation7 + $0x1], 1 }
 0x18d   :  { %455 = vsyncpa [#allocation4], 1 }
 0x18e   :  { %457 = vsyncpa [#allocation4 + $0x1], 1 }
 0x18f   :  { %458 = vsyncpa [#allocation5], 1 }
 0x190   :  { %460 = vsyncpa [#allocation5 + $0x1], 1 }

</bundles_post_ra>
